<compile_context>
chip_gen: v5e
topology: v5e:2x2
jax: 0.10.0
libtpu: 0.0.40
codegen_flags: <defaults>
</compile_context>

<pallas_src>
import functools
import math

import jax
import jax.numpy as jnp
from jax import lax
from jax.experimental import pallas as pl
from jax.experimental.pallas import tpu as pltpu

_LANE = 128
_SUBLANE = 8


def _acos_f32(x):
    """float32 arccos built only from sqrt/mul/add/select (Mosaic-safe).

    Cephes acosf-style argument reduction + asin core polynomial; accurate to a
    few f32 ulps on [-1, 1].
    """
    c0 = 1.6666752422e-1
    c1 = 7.4953002686e-2
    c2 = 4.5470025998e-2
    c3 = 2.4181311049e-2
    c4 = 4.2163199048e-2
    pi = jnp.float32(math.pi)

    ax = jnp.abs(x)
    big = ax > 0.5
    xr = jnp.where(big, jnp.sqrt(jnp.maximum(0.5 * (1.0 - ax), 0.0)), ax)
    z = xr * xr
    p = ((((c4 * z + c3) * z + c2) * z + c1) * z + c0) * z * xr + xr
    acos_abs = jnp.where(big, 2.0 * p, pi * 0.5 - p)
    return jnp.where(x < 0.0, pi - acos_abs, acos_abs)


def _he_kernel(feats_ref, gram_ref, energy_ref, *,
               he_s, eps, arc_eps, center, off_diag, abs_vals, use_exp,
               approx_recip, matmul_dtype):
    """One model-batch per grid step, fully VMEM resident.

    feats_ref : (bs, D)  f32
    gram_ref  : (bs, bs) f32   -- centered gram ("track['gram']")
    energy_ref: (8, 128) f32   -- scalar energy broadcast lane-dense; [0,0] used
    """
    x = feats_ref[...]                       # (bs, D) f32 (wrapper already cast)
    bs = x.shape[0]

    # ---- linear gram: G = X X^T on the MXU (f32 accumulate) ----
    xm = x if matmul_dtype is None else x.astype(matmul_dtype)
    g = lax.dot_general(xm, xm, (((1,), (1,)), ((), ())),
                        preferred_element_type=jnp.float32)          # (bs, bs)

    # ---- center_gram: Gc = G - rowmean - colmean + totmean ----
    if center:
        row_mean = jnp.mean(g, axis=-1, keepdims=True)               # (bs, 1)
        col_mean = jnp.mean(g, axis=-2, keepdims=True)               # (1, bs)
        tot_mean = jnp.mean(row_mean, axis=-2, keepdims=True)        # (1, 1)
        gc = g - row_mean - col_mean + tot_mean
    else:
        gc = g
    gram_ref[...] = gc.astype(gram_ref.dtype)

    # ---- row norms (tiny (bs,1) vector: exact reciprocal, negligible cost) ----
    norm_sq = jnp.sum(gc * gc, axis=-1, keepdims=True)               # (bs, 1)
    inv_norm = 1.0 / (jnp.sqrt(norm_sq) + eps)                       # (bs, 1)

    # unit rows via reciprocal-multiply (no full-size divide)
    v = gc * inv_norm
    vm = v if matmul_dtype is None else v.astype(matmul_dtype)
    cos = lax.dot_general(vm, vm, (((1,), (1,)), ((), ())),
                          preferred_element_type=jnp.float32)        # (bs, bs)

    def energy_elem(c):
        if abs_vals:
            c = jnp.abs(c)
        c = jnp.clip(c, -1.0 + arc_eps, 1.0 - arc_eps)
        arc = _acos_f32(c)
        if use_exp:
            return jnp.exp(-he_s * arc)
        if he_s == 2.0:
            arc_s = arc * arc
        else:
            arc_s = jnp.exp(he_s * jnp.log(arc))   # arc > 0 after clipping
        den = arc_s + eps
        if approx_recip:
            return pl.reciprocal(den, approx=True)   # EUP slot (otherwise idle)
        return 1.0 / den

    e = energy_elem(cos)                                             # (bs, bs)
    total = jnp.sum(jnp.sum(e, axis=-1, keepdims=True),
                    axis=-2, keepdims=True)                          # (1, 1)

    if off_diag:
        # Recompute diag(cos) from the row norms instead of building (bs,bs)
        # iota masks.  For any non-degenerate gram row the diagonal clips at
        # 1 - arc_eps in both paths, so the subtraction cancels exactly.
        cos_diag = norm_sq * inv_norm * inv_norm                     # (bs, 1)
        e_diag = energy_elem(cos_diag)                               # (bs, 1)
        diag_total = jnp.sum(e_diag, axis=-2, keepdims=True)         # (1, 1)
        energy = (total - diag_total) * (1.0 / float(bs * (bs - 1)))
    else:
        energy = total * (1.0 / float(bs * bs))

    # lane-dense (8,128) unmasked store; wrapper reads [b, 0, 0]
    energy_ref[...] = jnp.broadcast_to(energy, (_SUBLANE, _LANE))


def he_model_kernel(feats, *, he_s=2.0, eps=1e-6, arc_eps=1e-3, center=True,
                    reduction="off_diag", abs_vals=False, use_exp=False,
                    approx_recip=True, matmul_dtype=None):
    """HEModelKernel.forward: returns (energy, gram) = (energy, track['gram']).

    approx_recip: use EUP approximate reciprocal for 1/(arc^s+eps) (~1e-3-level
                  relative error, well inside the module's smoothing).  Set False
                  for exact VALU divides.
    matmul_dtype: optional (e.g. jnp.bfloat16) operand dtype for both MXU calls
                  (f32 accumulation).  Off by default since the gram is returned.
    """
    mbs, bs = feats.shape[:2]
    x = feats.reshape(mbs, bs, -1).astype(jnp.float32)   # glue: flatten features
    d = x.shape[-1]

    # eps / arc_eps are (non-learnable) scalar "parameters" of the torch module;
    # forward uses their abs().
    kern = functools.partial(
        _he_kernel,
        he_s=float(he_s), eps=abs(float(eps)), arc_eps=abs(float(arc_eps)),
        center=bool(center), off_diag=(reduction == "off_diag"),
        abs_vals=bool(abs_vals), use_exp=bool(use_exp),
        approx_recip=bool(approx_recip), matmul_dtype=matmul_dtype)

    def _pad(n, m):
        return ((n + m - 1) // m) * m

    # Rough per-grid-step VMEM budget: double-buffered in/out tiles + ~10 live
    # (bs,bs) f32 temporaries.  Only lift the scoped-VMEM default when needed.
    step_bytes = 4 * (2 * _pad(bs, 8) * _pad(d, 128)
                      + 2 * _pad(bs, 8) * _pad(bs, 128)
                      + 2 * _SUBLANE * _LANE
                      + 10 * _pad(bs, 8) * _pad(bs, 128))
    cparams = {"dimension_semantics": ("parallel",)}
    if step_bytes > 32 * 1024 * 1024:
        cparams["vmem_limit_bytes"] = int(step_bytes + (8 << 20))

    cost = pl.CostEstimate(
        flops=int(2 * mbs * bs * bs * (d + bs) + 40 * mbs * bs * bs),
        transcendentals=int(2 * mbs * bs * bs),
        bytes_accessed=int(4 * mbs * (bs * d + bs * bs + _SUBLANE * _LANE)))

    gram, energy_slab = pl.pallas_call(
        kern,
        out_shape=(jax.ShapeDtypeStruct((mbs, bs, bs), jnp.float32),
                   jax.ShapeDtypeStruct((mbs, _SUBLANE, _LANE), jnp.float32)),
        grid_spec=pltpu.PrefetchScalarGridSpec(
            num_scalar_prefetch=0,
            grid=(mbs,),
            in_specs=[pl.BlockSpec((None, bs, d), lambda b: (b, 0, 0))],
            out_specs=(pl.BlockSpec((None, bs, bs), lambda b: (b, 0, 0)),
                       pl.BlockSpec((None, _SUBLANE, _LANE),
                                    lambda b: (b, 0, 0)))),
        compiler_params=pltpu.CompilerParams(**cparams),
        cost_estimate=cost,
    )(x)
    return energy_slab[:, 0, 0], gram


def _reference(feats, he_s=2.0, eps=1e-6, arc_eps=1e-3):
    """Pure-JAX reference (same math, jnp.arccos) for correctness checking."""
    mbs, bs = feats.shape[:2]
    x = feats.reshape(mbs, bs, -1).astype(jnp.float32)
    g = jnp.einsum("bid,bjd->bij", x, x)
    row = jnp.mean(g, -1, keepdims=True)
    col = jnp.mean(g, -2, keepdims=True)
    tot = jnp.mean(g, (-1, -2), keepdims=True)
    gc = g - row - col + tot
    v = gc / (jnp.linalg.norm(gc, axis=-1, keepdims=True) + eps)
    cos = jnp.einsum("bid,bjd->bij", v, v)
    cos = jnp.clip(cos, -1.0 + arc_eps, 1.0 - arc_eps)
    arc = jnp.arccos(cos)
    e = 1.0 / (arc ** he_s + eps)
    e = e * (1.0 - jnp.eye(bs, dtype=jnp.float32)[None])
    energy = jnp.sum(e, axis=(-1, -2)) / (bs * (bs - 1))
    return energy, gc


if __name__ == "__main__":
    key = jax.random.PRNGKey(0)
    # model_bs=2 models, batch=8 samples, features (4, 8) flattened to D=32
    mbs, bs, c, h = 2, 8, 4, 8
    feats = jax.random.normal(key, (mbs, bs, c, h), dtype=jnp.float32)

    energy, gram = jax.jit(he_model_kernel)(feats)
    energy = jax.block_until_ready(energy)
    gram = jax.block_until_ready(gram)

    e_ref, g_ref = _reference(feats)
    assert energy.shape == (mbs,) and gram.shape == (mbs, bs, bs)
    assert bool(jnp.all(jnp.isfinite(energy))) and bool(jnp.all(jnp.isfinite(gram)))
    assert jnp.allclose(gram, g_ref, rtol=1e-2, atol=1e-2), "gram mismatch"
    assert jnp.allclose(energy, e_ref, rtol=1e-2, atol=1e-2), "energy mismatch"

    print("KERNEL_OK")
</pallas_src>

<mosaic_0001>
module attributes {stable_mosaic.version = 11 : i64} {
  func.func @_he_kernel(%arg0: i32, %arg1: memref<1x8x32xf32, #tpu.memory_space<vmem>>, %arg2: memref<1x8x8xf32, #tpu.memory_space<vmem>>, %arg3: memref<1x8x128xf32, #tpu.memory_space<vmem>>) attributes {dimension_semantics = [#tpu.dimension_semantics<parallel>], iteration_bounds = array<i64: 2>, scalar_prefetch = 0 : i64, scratch_operands = 0 : i64, tpu.core_type = #tpu.core_type<tc>, window_params = [{transform_indices = @transform_0, window_bounds = array<i64: 1, 8, 32>}, {transform_indices = @transform_1, window_bounds = array<i64: 1, 8, 8>}, {transform_indices = @transform_2, window_bounds = array<i64: 1, 8, 128>}]} {
    %c0 = arith.constant 0 : index
    %c0_0 = arith.constant 0 : index
    %c0_1 = arith.constant 0 : index
    %0 = vector.load %arg1[%c0, %c0_0, %c0_1] : memref<1x8x32xf32, #tpu.memory_space<vmem>>, vector<1x8x32xf32>
    %1 = vector.shape_cast %0 : vector<1x8x32xf32> to vector<8x32xf32>
    %cst = arith.constant dense<0.000000e+00> : vector<8x8xf32>
    %2 = tpu.matmul %1, %1, %cst {dimension_numbers = #tpu.dot_dimension_numbers<[1], [1], [0], [0], [0, 0, 1, 0], [], []>} : vector<8x32xf32>, vector<8x32xf32>, vector<8x8xf32> -> vector<8x8xf32>
    %cst_2 = arith.constant dense<0.000000e+00> : vector<8xf32>
    %3 = vector.multi_reduction <add>, %2, %cst_2 [1] : vector<8x8xf32> to vector<8xf32>
    %4 = vector.shape_cast %3 : vector<8xf32> to vector<8x1xf32>
    %cst_3 = arith.constant 8.000000e+00 : f32
    %5 = vector.broadcast %cst_3 : f32 to vector<8x1xf32>
    %6 = arith.divf %4, %5 : vector<8x1xf32>
    %cst_4 = arith.constant dense<0.000000e+00> : vector<8xf32>
    %7 = vector.multi_reduction <add>, %2, %cst_4 [0] : vector<8x8xf32> to vector<8xf32>
    %8 = vector.shape_cast %7 : vector<8xf32> to vector<1x8xf32>
    %cst_5 = arith.constant 8.000000e+00 : f32
    %9 = vector.broadcast %cst_5 : f32 to vector<1x8xf32>
    %10 = arith.divf %8, %9 : vector<1x8xf32>
    %cst_6 = arith.constant dense<0.000000e+00> : vector<1xf32>
    %11 = vector.multi_reduction <add>, %6, %cst_6 [0] : vector<8x1xf32> to vector<1xf32>
    %12 = vector.shape_cast %11 : vector<1xf32> to vector<1x1xf32>
    %cst_7 = arith.constant 8.000000e+00 : f32
    %13 = vector.broadcast %cst_7 : f32 to vector<1x1xf32>
    %14 = arith.divf %12, %13 : vector<1x1xf32>
    %15 = vector.broadcast %6 : vector<8x1xf32> to vector<8x8xf32>
    %16 = arith.subf %2, %15 : vector<8x8xf32>
    %17 = vector.broadcast %10 : vector<1x8xf32> to vector<8x8xf32>
    %18 = arith.subf %16, %17 : vector<8x8xf32>
    %19 = vector.broadcast %14 : vector<1x1xf32> to vector<8x8xf32>
    %20 = arith.addf %18, %19 : vector<8x8xf32>
    %c0_8 = arith.constant 0 : index
    %c0_9 = arith.constant 0 : index
    %c0_10 = arith.constant 0 : index
    %21 = vector.load %arg2[%c0_8, %c0_9, %c0_10] : memref<1x8x8xf32, #tpu.memory_space<vmem>>, vector<1x8x8xf32>
    %22 = vector.shape_cast %21 : vector<1x8x8xf32> to vector<8x8xf32>
    %23 = vector.shape_cast %20 : vector<8x8xf32> to vector<1x8x8xf32>
    tpu.vector_store %arg2[%c0_8, %c0_9, %c0_10], %23 {strides = array<i32>} : memref<1x8x8xf32, #tpu.memory_space<vmem>>, vector<1x8x8xf32>,
    %24 = arith.mulf %20, %20 : vector<8x8xf32>
    %cst_11 = arith.constant dense<0.000000e+00> : vector<8xf32>
    %25 = vector.multi_reduction <add>, %24, %cst_11 [1] : vector<8x8xf32> to vector<8xf32>
    %26 = vector.shape_cast %25 : vector<8xf32> to vector<8x1xf32>
    %27 = math.sqrt %26 : vector<8x1xf32>
    %cst_12 = arith.constant 9.99999997E-7 : f32
    %28 = vector.broadcast %cst_12 : f32 to vector<8x1xf32>
    %29 = arith.addf %27, %28 : vector<8x1xf32>
    %cst_13 = arith.constant 1.000000e+00 : f32
    %30 = vector.broadcast %cst_13 : f32 to vector<8x1xf32>
    %31 = arith.divf %30, %29 : vector<8x1xf32>
    %32 = vector.broadcast %31 : vector<8x1xf32> to vector<8x8xf32>
    %33 = arith.mulf %20, %32 : vector<8x8xf32>
    %cst_14 = arith.constant dense<0.000000e+00> : vector<8x8xf32>
    %34 = tpu.matmul %33, %33, %cst_14 {dimension_numbers = #tpu.dot_dimension_numbers<[1], [1], [0], [0], [0, 0, 1, 0], [], []>} : vector<8x8xf32>, vector<8x8xf32>, vector<8x8xf32> -> vector<8x8xf32>
    %cst_15 = arith.constant -9.990000e-01 : f32
    %cst_16 = arith.constant 9.990000e-01 : f32
    %35 = vector.broadcast %cst_15 : f32 to vector<8x8xf32>
    %36 = arith.maximumf %35, %34 : vector<8x8xf32>
    %37 = vector.broadcast %cst_16 : f32 to vector<8x8xf32>
    %38 = arith.minimumf %37, %36 : vector<8x8xf32>
    %39 = math.absf %38 : vector<8x8xf32>
    %cst_17 = arith.constant 5.000000e-01 : f32
    %40 = vector.broadcast %cst_17 : f32 to vector<8x8xf32>
    %41 = arith.cmpf ogt, %39, %40 : vector<8x8xf32>
    %cst_18 = arith.constant 1.000000e+00 : f32
    %42 = vector.broadcast %cst_18 : f32 to vector<8x8xf32>
    %43 = arith.subf %42, %39 : vector<8x8xf32>
    %cst_19 = arith.constant 5.000000e-01 : f32
    %44 = vector.broadcast %cst_19 : f32 to vector<8x8xf32>
    %45 = arith.mulf %44, %43 : vector<8x8xf32>
    %cst_20 = arith.constant 0.000000e+00 : f32
    %46 = vector.broadcast %cst_20 : f32 to vector<8x8xf32>
    %47 = arith.maximumf %45, %46 : vector<8x8xf32>
    %48 = math.sqrt %47 : vector<8x8xf32>
    %49 = arith.select %41, %48, %39 : vector<8x8xi1>, vector<8x8xf32>
    %50 = arith.mulf %49, %49 : vector<8x8xf32>
    %cst_21 = arith.constant 4.216320e-02 : f32
    %51 = vector.broadcast %cst_21 : f32 to vector<8x8xf32>
    %52 = arith.mulf %51, %50 : vector<8x8xf32>
    %cst_22 = arith.constant 0.024181312 : f32
    %53 = vector.broadcast %cst_22 : f32 to vector<8x8xf32>
    %54 = arith.addf %52, %53 : vector<8x8xf32>
    %55 = arith.mulf %54, %50 : vector<8x8xf32>
    %cst_23 = arith.constant 0.0454700254 : f32
    %56 = vector.broadcast %cst_23 : f32 to vector<8x8xf32>
    %57 = arith.addf %55, %56 : vector<8x8xf32>
    %58 = arith.mulf %57, %50 : vector<8x8xf32>
    %cst_24 = arith.constant 0.0749530047 : f32
    %59 = vector.broadcast %cst_24 : f32 to vector<8x8xf32>
    %60 = arith.addf %58, %59 : vector<8x8xf32>
    %61 = arith.mulf %60, %50 : vector<8x8xf32>
    %cst_25 = arith.constant 0.166667521 : f32
    %62 = vector.broadcast %cst_25 : f32 to vector<8x8xf32>
    %63 = arith.addf %61, %62 : vector<8x8xf32>
    %64 = arith.mulf %63, %50 : vector<8x8xf32>
    %65 = arith.mulf %64, %49 : vector<8x8xf32>
    %66 = arith.addf %65, %49 : vector<8x8xf32>
    %cst_26 = arith.constant 2.000000e+00 : f32
    %67 = vector.broadcast %cst_26 : f32 to vector<8x8xf32>
    %68 = arith.mulf %67, %66 : vector<8x8xf32>
    %cst_27 = arith.constant 3.14159274 : f32
    %cst_28 = arith.constant 5.000000e-01 : f32
    %69 = arith.mulf %cst_27, %cst_28 : f32
    %70 = vector.broadcast %69 : f32 to vector<8x8xf32>
    %71 = arith.subf %70, %66 : vector<8x8xf32>
    %72 = arith.select %41, %68, %71 : vector<8x8xi1>, vector<8x8xf32>
    %cst_29 = arith.constant 0.000000e+00 : f32
    %73 = vector.broadcast %cst_29 : f32 to vector<8x8xf32>
    %74 = arith.cmpf olt, %38, %73 : vector<8x8xf32>
    %cst_30 = arith.constant 3.14159274 : f32
    %75 = vector.broadcast %cst_30 : f32 to vector<8x8xf32>
    %76 = arith.subf %75, %72 : vector<8x8xf32>
    %77 = arith.select %74, %76, %72 : vector<8x8xi1>, vector<8x8xf32>
    %78 = arith.mulf %77, %77 : vector<8x8xf32>
    %cst_31 = arith.constant 9.99999997E-7 : f32
    %79 = vector.broadcast %cst_31 : f32 to vector<8x8xf32>
    %80 = arith.addf %78, %79 : vector<8x8xf32>
    %81 = tpu.reciprocal %80 {approx = true} : vector<8x8xf32> -> vector<8x8xf32>
    %cst_32 = arith.constant dense<0.000000e+00> : vector<8xf32>
    %82 = vector.multi_reduction <add>, %81, %cst_32 [1] : vector<8x8xf32> to vector<8xf32>
    %83 = vector.shape_cast %82 : vector<8xf32> to vector<8x1xf32>
    %cst_33 = arith.constant dense<0.000000e+00> : vector<1xf32>
    %84 = vector.multi_reduction <add>, %83, %cst_33 [0] : vector<8x1xf32> to vector<1xf32>
    %85 = vector.shape_cast %84 : vector<1xf32> to vector<1x1xf32>
    %86 = arith.mulf %26, %31 : vector<8x1xf32>
    %87 = arith.mulf %86, %31 : vector<8x1xf32>
    %cst_34 = arith.constant -9.990000e-01 : f32
    %cst_35 = arith.constant 9.990000e-01 : f32
    %88 = vector.broadcast %cst_34 : f32 to vector<8x1xf32>
    %89 = arith.maximumf %88, %87 : vector<8x1xf32>
    %90 = vector.broadcast %cst_35 : f32 to vector<8x1xf32>
    %91 = arith.minimumf %90, %89 : vector<8x1xf32>
    %92 = math.absf %91 : vector<8x1xf32>
    %cst_36 = arith.constant 5.000000e-01 : f32
    %93 = vector.broadcast %cst_36 : f32 to vector<8x1xf32>
    %94 = arith.cmpf ogt, %92, %93 : vector<8x1xf32>
    %cst_37 = arith.constant 1.000000e+00 : f32
    %95 = vector.broadcast %cst_37 : f32 to vector<8x1xf32>
    %96 = arith.subf %95, %92 : vector<8x1xf32>
    %cst_38 = arith.constant 5.000000e-01 : f32
    %97 = vector.broadcast %cst_38 : f32 to vector<8x1xf32>
    %98 = arith.mulf %97, %96 : vector<8x1xf32>
    %cst_39 = arith.constant 0.000000e+00 : f32
    %99 = vector.broadcast %cst_39 : f32 to vector<8x1xf32>
    %100 = arith.maximumf %98, %99 : vector<8x1xf32>
    %101 = math.sqrt %100 : vector<8x1xf32>
    %102 = arith.select %94, %101, %92 : vector<8x1xi1>, vector<8x1xf32>
    %103 = arith.mulf %102, %102 : vector<8x1xf32>
    %cst_40 = arith.constant 4.216320e-02 : f32
    %104 = vector.broadcast %cst_40 : f32 to vector<8x1xf32>
    %105 = arith.mulf %104, %103 : vector<8x1xf32>
    %cst_41 = arith.constant 0.024181312 : f32
    %106 = vector.broadcast %cst_41 : f32 to vector<8x1xf32>
    %107 = arith.addf %105, %106 : vector<8x1xf32>
    %108 = arith.mulf %107, %103 : vector<8x1xf32>
    %cst_42 = arith.constant 0.0454700254 : f32
    %109 = vector.broadcast %cst_42 : f32 to vector<8x1xf32>
    %110 = arith.addf %108, %109 : vector<8x1xf32>
    %111 = arith.mulf %110, %103 : vector<8x1xf32>
    %cst_43 = arith.constant 0.0749530047 : f32
    %112 = vector.broadcast %cst_43 : f32 to vector<8x1xf32>
    %113 = arith.addf %111, %112 : vector<8x1xf32>
    %114 = arith.mulf %113, %103 : vector<8x1xf32>
    %cst_44 = arith.constant 0.166667521 : f32
    %115 = vector.broadcast %cst_44 : f32 to vector<8x1xf32>
    %116 = arith.addf %114, %115 : vector<8x1xf32>
    %117 = arith.mulf %116, %103 : vector<8x1xf32>
    %118 = arith.mulf %117, %102 : vector<8x1xf32>
    %119 = arith.addf %118, %102 : vector<8x1xf32>
    %cst_45 = arith.constant 2.000000e+00 : f32
    %120 = vector.broadcast %cst_45 : f32 to vector<8x1xf32>
    %121 = arith.mulf %120, %119 : vector<8x1xf32>
    %cst_46 = arith.constant 3.14159274 : f32
    %cst_47 = arith.constant 5.000000e-01 : f32
    %122 = arith.mulf %cst_46, %cst_47 : f32
    %123 = vector.broadcast %122 : f32 to vector<8x1xf32>
    %124 = arith.subf %123, %119 : vector<8x1xf32>
    %125 = arith.select %94, %121, %124 : vector<8x1xi1>, vector<8x1xf32>
    %cst_48 = arith.constant 0.000000e+00 : f32
    %126 = vector.broadcast %cst_48 : f32 to vector<8x1xf32>
    %127 = arith.cmpf olt, %91, %126 : vector<8x1xf32>
    %cst_49 = arith.constant 3.14159274 : f32
    %128 = vector.broadcast %cst_49 : f32 to vector<8x1xf32>
    %129 = arith.subf %128, %125 : vector<8x1xf32>
    %130 = arith.select %127, %129, %125 : vector<8x1xi1>, vector<8x1xf32>
    %131 = arith.mulf %130, %130 : vector<8x1xf32>
    %cst_50 = arith.constant 9.99999997E-7 : f32
    %132 = vector.broadcast %cst_50 : f32 to vector<8x1xf32>
    %133 = arith.addf %131, %132 : vector<8x1xf32>
    %134 = tpu.reciprocal %133 {approx = true} : vector<8x1xf32> -> vector<8x1xf32>
    %cst_51 = arith.constant dense<0.000000e+00> : vector<1xf32>
    %135 = vector.multi_reduction <add>, %134, %cst_51 [0] : vector<8x1xf32> to vector<1xf32>
    %136 = vector.shape_cast %135 : vector<1xf32> to vector<1x1xf32>
    %137 = arith.subf %85, %136 : vector<1x1xf32>
    %cst_52 = arith.constant 0.0178571437 : f32
    %138 = vector.broadcast %cst_52 : f32 to vector<1x1xf32>
    %139 = arith.mulf %137, %138 : vector<1x1xf32>
    %140 = vector.shape_cast %139 : vector<1x1xf32> to vector<1x1xf32>
    %141 = vector.broadcast %140 : vector<1x1xf32> to vector<8x128xf32>
    %c0_53 = arith.constant 0 : index
    %c0_54 = arith.constant 0 : index
    %c0_55 = arith.constant 0 : index
    %142 = vector.load %arg3[%c0_53, %c0_54, %c0_55] : memref<1x8x128xf32, #tpu.memory_space<vmem>>, vector<1x8x128xf32>
    %143 = vector.shape_cast %142 : vector<1x8x128xf32> to vector<8x128xf32>
    %144 = vector.shape_cast %141 : vector<8x128xf32> to vector<1x8x128xf32>
    tpu.vector_store %arg3[%c0_53, %c0_54, %c0_55], %144 {strides = array<i32>} : memref<1x8x128xf32, #tpu.memory_space<vmem>>, vector<1x8x128xf32>,
    return
  }
  func.func @transform_0(%arg0: i32) -> (i32, i32, i32) {
    %c0_i32 = arith.constant 0 : i32
    %c0_i32_0 = arith.constant 0 : i32
    %c0_i32_1 = arith.constant 0 : i32
    return %arg0, %c0_i32, %c0_i32_0 : i32, i32, i32
  }
  func.func @transform_1(%arg0: i32) -> (i32, i32, i32) {
    %c0_i32 = arith.constant 0 : i32
    %c0_i32_0 = arith.constant 0 : i32
    %c0_i32_1 = arith.constant 0 : i32
    return %arg0, %c0_i32, %c0_i32_0 : i32, i32, i32
  }
  func.func @transform_2(%arg0: i32) -> (i32, i32, i32) {
    %c0_i32 = arith.constant 0 : i32
    %c0_i32_0 = arith.constant 0 : i32
    %c0_i32_1 = arith.constant 0 : i32
    return %arg0, %c0_i32, %c0_i32_0 : i32, i32, i32
  }
}

</mosaic_0001>

<bundles_post_ra>
// kernel: he_model_kernel.1
= control target key start
LH: loop header
LB: loop body
LE: loop exit
PB: predicated region body
PF: predicated region fallthrough
CT: control target
= control target key end

     0   :  { %8 = vsyncpa [#allocation3], 0  ;;  %s750_s0 = inlined_call_operand.vmem [shape: f32[2,8,32], index: 0, kind: input, shape index: {}]   ;;  %s751_s1 = inlined_call_operand.hbm [shape: f32[2,8,8], index: 1, kind: output, shape index: {0}]   ;;  %s752_s2 = inlined_call_operand.vmem [shape: f32[2,8,128], index: 2, kind: output, shape index: {1}]  }
   0x1   :  { %10 = vsyncpa [#allocation3 + $0x1], 0  ;;  %s620_s9 = smov 0   ;;  %s622_s10 = smov 0  }
   0x2   :  { %s624_s11 = smov 0   ;;  %s626_s12 = smov 0  }
   0x3 LB: > { %s641_s13 = sadd.s32 4294967295, %s602_s12   ;;  %s469_s14 = sadd.s32 4294967294, %s602_s12   ;;  %s602_s12 = sphi %s626_s12, %s758_s12   ;;  %s598_s11 = sphi %s624_s11, %s757_s11   ;;  %s594_s10 = sphi %s622_s10, %s756_s10   ;;  %s590_s9 = sphi %s620_s9, %s755_s9  }
   0x4   : > { %s645_s15 = sadd.s32 1, %s602_s12   ;;  %s49_s16 = sadd.s32 1, %s598_s11 }
   0x5   : > { %s46_s17 = ssub.s32 %s602_s12, %s645_s15  ;;  %p59_p0 = scmp.ne.s32.totalorder %s598_s11, %s594_s10 }
   0x6   : > { %p47_p1 = scmp.eq.s32.totalorder %s46_s17, 0  ;;  %p60_p2 = scmp.eq.s32.totalorder %s641_s13, 1 }
   0x7   : > { %p65_p3 = scmp.ne.s32.totalorder %s594_s10, %s590_s9  ;;  %p66_p4 = scmp.eq.s32.totalorder %s469_s14, 1 }
   0x8   : > { %s656_s18 = scalar_select %p47_p1, %s598_s11, %s49_s16  }
   0x9   : > { %p658_p5 = por %p60_p2, %p59_p0  ;;  %p662_p6 = por %p66_p4, %p65_p3 }
   0xa   : > { %p472_p7 = scmp.ge.s32.totalorder %s602_s12, 1  ;;  %p117_p8 = scmp.lt.s32.totalorder %s602_s12, 3 }
   0xc   : > { %p118_p9 = pnand %p472_p7, %p117_p8 }
   0xd   : > { %p142_p10 = scmp.lt.s32.totalorder (!%p118_p9), %s641_s13, 1  ;;  %s133_s26 = sand.u32 (!%p118_p9), 1, %s594_s10  }
   0xe   : > { %121 = sbr.rel (%p118_p9) target bundleno = 785 (0x311), region = 24  ;;  %s682_s27 = sshll.u32 (!%p118_p9), %s133_s26, 3 }
   0xf   : > { %s135_s28 = scalar_lea.vmem (!%p118_p9), [#allocation2], %s682_s27  ;;  %s483_s29 = sshll.u32 (!%p118_p9), %s641_s13, 3 }
  0x10   : > { %s378_s4 = scalar_lea.hbm (!%p118_p9), %s751_s1, %s483_s29  ;;  %s380_s5 = sshll.u32 (!%p118_p9), %s135_s28, 4  ;;  %s381_s5 = int_to_ptr.vmem [resolvable:$true] %s380_s5 }
  0x11   : > { %s382_s6 = sshll.u32 (!%p118_p9), %s378_s4, 4  ;;  %s364_s7 = scalar_lea.sflag (!%p118_p9), [#allocation3], %s133_s26  ;;  %s383_s6 = int_to_ptr.hbm [resolvable:$true] %s382_s6 }
  0x12   : > { %s554_s8 = sshra.s32 (!%p118_p9), %s383_s6, 4  ;;  %s560_s17 = scalar_lea.hbm (!%p118_p9), %s751_s1, 16  ;;  %s555_s8 = int_to_ptr.hbm [resolvable:$true] %s554_s8 }
  0x13   : > { %s670_s21 = scalar_select %p142_p10, %s641_s13, 1  ;;  %vm151_vm0 = vcmask 261120   ;;  %vm175_vm1 = vcmask 64512   ;;  %v604_v3 = vmov 8.0  }
  0x14   : > { %526 = vrcp.f32 %v604_v3  ;;  %s556_s14 = scalar_lea.hbm %s555_s8, 8  ;;  %p561_p0 = scmp.lt.s32.totalorder %s555_s8, %s751_s1 }
  0x15   : > { %s474_s22 = sshll.u32 %s670_s21, 3  ;;  %p557_p11 = scmp.ne.s32.totalorder %s555_s8, %s556_s14 }
  0x16   : > { %s145_s25 = scalar_lea.vmem %s750_s0, %s474_s22  ;;  %p562_p1 = scmp.lt.s32.totalorder %s560_s17, %s556_s14 }
  0x17   : > { %v150_v0 = vld [vmem:[%s145_s25] sm:$0xff]  ;;  %p558_p12 = pnand %p557_p11, %p658_p5 }
  0x18   : > { %476 = vmatpush.xpose.msk.msra.mxu0 %vm151_vm0, %v150_v0  ;;  %p563_p2 = por %p562_p1, %p561_p0 }
  0x19   : > { %p559_p13 = pneg %p558_p12 }
  0x1a   : > { %v527_v4 = vpop.eup %526 }
  0x1b   : > { %477 = vmatmul.msk.f32.vlgmr.msra.gmra.mxu0 %vm151_vm0, %v150_v0  ;;  %v180_v5 = vmul.f32 8.0, %v527_v4  ;;  %vm184_vm2 = vweird.f32 %v527_v4  ;;  %p564_p3 = pnand %p563_p2, %p559_p13 }
  0x1d   : > { %v181_v6 = vsub.f32 1.0, %v180_v5 }
  0x1f   : > { %v182_v8 = vmul.f32 %v527_v4, %v181_v6 }
  0x21   : > { %v183_v10 = vadd.f32 %v527_v4, %v182_v8 }
  0x23   : > { %v185_v12 = vsel %vm184_vm2, %v527_v4, %v183_v10 }
  0x98   : > { %v172_v1 = vpop.f32.mrf.mxu0 }
  0x99   : > { %v176_v2 = vsel %vm175_vm1, %v172_v1, 0.0 }
  0x9a   : > { %177 = vadd.xlane.f32.xlu0 %v176_v2  ;;  %v187_v7 = vrot.slane %v176_v2, 4 }
  0x9c   : > { %v188_v9 = vadd.f32 %v187_v7, %v176_v2 }
  0x9e   : > { %v189_v11 = vrot.slane %v188_v9, 2 }
  0xa0   : > { %v190_v14 = vadd.f32 %v189_v11, %v188_v9 }
  0xa2   : > { %v191_v17 = vrot.slane %v190_v14, 1 }
  0xa4   : > { %v192_v20 = vadd.f32 %v191_v17, %v190_v14 }
  0xa6   : > { %v193_v24 = vmul.f32 %v192_v20, %v185_v12 }
 0x10d   : > { %v178_v13 = vpop.xlane.xlu0 %177 }
 0x10e   : > { %v186_v15 = vmul.f32 %v185_v12, %v178_v13 }
 0x110   : > { %v194_v16 = vrot.slane %v186_v15, 4  ;;  %v201_v23 = vsub.f32 %v172_v1, %v186_v15 }
 0x112   : > { %v195_v18 = vadd.f32 %v194_v16, %v186_v15  ;;  %v202_v27 = vsub.f32 %v201_v23, %v193_v24 }
 0x114   : > { %v196_v19 = vrot.slane %v195_v18, 2 }
 0x116   : > { %v197_v21 = vadd.f32 %v196_v19, %v195_v18 }
 0x118   : > { %v198_v22 = vrot.slane %v197_v21, 1 }
 0x11a   : > { %v199_v25 = vadd.f32 %v198_v22, %v197_v21 }
 0x11c   : > { %v200_v26 = vmul.f32 %v199_v25, %v185_v12 }
 0x11e   : > { %v203_v28 = vadd.f32 %v202_v27, %v200_v26 }
 0x120   : > { %v205_v29 = vmul.f32 %v203_v28, %v203_v28  ;;  %204 = vst.msk [vmem:[%s135_s28] sm:$0xff] %vm175_vm1, %v203_v28 }
 0x122   : > { %v206_v30 = vsel %vm175_vm1, %v205_v29, 0.0 }
 0x123   : > { %207 = vadd.xlane.f32.xlu0 %v206_v30 }
 0x196   : > { %v208_v31 = vpop.xlane.xlu0 %207 }
 0x197   : > { %528 = vrsqrt.f32 %v208_v31  ;;  %vm216_vm3 = vcmp.eq.f32.partialorder %v208_v31, inf  ;;  %v219_v39 = vand.u32 2147483648, %v208_v31  ;;  %vm218_vm4 = vcmp.eq.f32.partialorder %v208_v31, 0.0 }
 0x19d   : > { %v529_v32 = vpop.eup %528 }
 0x19e   : > { %v210_v33 = vmul.f32 %v529_v32, %v208_v31 }
 0x1a0   : > { %v211_v34 = vmul.f32 %v529_v32, %v210_v33 }
 0x1a2   : > { %v212_v35 = vmul.f32 0.5, %v211_v34 }
 0x1a4   : > { %v213_v36 = vsub.f32 1.5, %v212_v35 }
 0x1a6   : > { %v214_v37 = vmul.f32 %v529_v32, %v213_v36 }
 0x1a8   : > { %v215_v38 = vmul.f32 %v214_v37, %v208_v31 }
 0x1aa   : > { %v217_v40 = vsel %vm216_vm3, %v208_v31, %v215_v38 }
 0x1ab   : > { %v220_v41 = vsel %vm218_vm4, %v219_v39, %v217_v40 }
 0x1ac   : > { %v221_v42 = vadd.f32 1e-06, %v220_v41 }
 0x1ae   : > { %530 = vrcp.f32 %v221_v42  ;;  %v233_v46 = vand.u32 2147483648, %v221_v42  ;;  %v231_v48 = vand.u32 2147483647, %v221_v42  ;;  %vm227_vm6 = vweird.f32 %v221_v42 }
 0x1b0   : > { %v234_v50 = vor.u32 1.1754944e-38, %v233_v46  ;;  %vm232_vm8 = vcmp.eq.f32.partialorder %v231_v48, 8.507059e+37 }
 0x1b4   : > { %v531_v43 = vpop.eup %530 }
 0x1b5   : > { %v223_v44 = vmul.f32 %v531_v43, %v221_v42  ;;  %vm228_vm5 = vweird.f32 %v531_v43 }
 0x1b6   : > { %vm229_vm7 = vmor %vm227_vm6, %vm228_vm5 }
 0x1b7   : > { %v224_v45 = vsub.f32 1.0, %v223_v44 }
 0x1b9   : > { %v225_v47 = vmul.f32 %v531_v43, %v224_v45 }
 0x1bb   : > { %v226_v49 = vadd.f32 %v531_v43, %v225_v47 }
 0x1bd   : > { %v230_v51 = vsel %vm229_vm7, %v531_v43, %v226_v49 }
 0x1be   : > { %v235_v52 = vsel %vm232_vm8, %v234_v50, %v230_v51 }
 0x1bf   : > { %v237_v53 = vmul.f32 %v235_v52, %v203_v28  ;;  %v311_v54 = vmul.f32 %v235_v52, %v208_v31 }
 0x1c1   : > { %478 = vmatpush.xpose.msk.msra.mxu1 %vm175_vm1, %v237_v53  ;;  %v690_v55 = vmul.f32 %v311_v54, %v235_v52 }
 0x1c3   : > { %v481_v13 = vclamps-f32 %v690_v55, 0.999 }
 0x1c4   : > { %479 = vmatmul.msk.f32.vlgmr.msra.gmra.mxu1 %vm175_vm1, %v237_v53 }
 0x1c5   : > { %v697_v16 = vand.u32 2147483647, %v481_v13 }
 0x1c7   : > { %v317_v19 = vsub.f32 1.0, %v697_v16 }
 0x1c9   : > { %v318_v22 = vmul.f32 0.5, %v317_v19 }
 0x1cb   : > { %v319_v25 = vmax.f32 %v318_v22, 0.0 }
 0x241   : > { %v258_v56 = vpop.f32.mrf.mxu1 }
 0x242   : > { %v480_v57 = vclamps-f32 %v258_v56, 0.999 }
 0x244   : > { %v263_v58 = vand.u32 2147483647, %v480_v57  ;;  %vm296_vm12 = vcmp.lt.f32.partialorder %v480_v57, 0.0 }
 0x246   : > { %v265_v59 = vsub.f32 1.0, %v263_v58  ;;  %vm264_vm11 = vcmp.gt.f32.partialorder %v263_v58, 0.5 }
 0x248   : > { %v266_v60 = vmul.f32 0.5, %v265_v59 }
 0x24a   : > { %v267_v61 = vmax.f32 %v266_v60, 0.0 }
 0x24c   : > { %532 = vrsqrt.f32 %v267_v61  ;;  %vm275_vm9 = vcmp.eq.f32.partialorder %v267_v61, inf  ;;  %v278_v5 = vand.u32 2147483648, %v267_v61  ;;  %vm277_vm10 = vcmp.eq.f32.partialorder %v267_v61, 0.0 }
 0x24d   : > { %534 = vrsqrt.f32 %v319_v25 }
 0x252   : > { %v533_v62 = vpop.eup %532 }
 0x253   : > { %v269_v63 = vmul.f32 %v533_v62, %v267_v61  ;;  %v535_v33 = vpop.eup %534 }
 0x254   : > { %v321_v34 = vmul.f32 %v535_v33, %v319_v25 }
 0x255   : > { %v270_v0 = vmul.f32 %v533_v62, %v269_v63 }
 0x256   : > { %v322_v36 = vmul.f32 %v535_v33, %v321_v34 }
 0x257   : > { %v271_v1 = vmul.f32 0.5, %v270_v0 }
 0x258   : > { %v323_v38 = vmul.f32 0.5, %v322_v36 }
 0x259   : > { %v272_v2 = vsub.f32 1.5, %v271_v1 }
 0x25b   : > { %v273_v3 = vmul.f32 %v533_v62, %v272_v2 }
 0x25d   : > { %v274_v4 = vmul.f32 %v273_v3, %v267_v61 }
 0x25f   : > { %v276_v6 = vsel %vm275_vm9, %v267_v61, %v274_v4 }
 0x260   : > { %v279_v7 = vsel %vm277_vm10, %v278_v5, %v276_v6 }
 0x261   : > { %v280_v8 = vsel %vm264_vm11, %v279_v7, %v263_v58 }
 0x262   : > { %v281_v9 = vmul.f32 %v280_v8, %v280_v8 }
 0x264   : > { %v282_v10 = vmul.f32 0.0421632, %v281_v9 }
 0x266   : > { %v283_v11 = vadd.f32 0.024181312, %v282_v10 }
 0x268   : > { %v284_v12 = vmul.f32 %v283_v11, %v281_v9 }
 0x26a   : > { %v285_v14 = vadd.f32 0.045470025, %v284_v12 }
 0x26c   : > { %v286_v15 = vmul.f32 %v285_v14, %v281_v9 }
 0x26e   : > { %v287_v17 = vadd.f32 0.074953005, %v286_v15 }
 0x270   : > { %v288_v18 = vmul.f32 %v287_v17, %v281_v9 }
 0x272   : > { %v289_v20 = vadd.f32 0.16666752, %v288_v18 }
 0x274   : > { %v290_v21 = vmul.f32 %v289_v20, %v281_v9 }
 0x276   : > { %v291_v23 = vmul.f32 %v290_v21, %v280_v8 }
 0x278   : > { %v292_v24 = vadd.f32 %v291_v23, %v280_v8 }
 0x27a   : > { %v293_v26 = vmul.f32 2.0, %v292_v24  ;;  %v294_v27 = vsub.f32 1.5707964, %v292_v24 }
 0x27c   : > { %v295_v28 = vsel %vm264_vm11, %v293_v26, %v294_v27 }
 0x27d   : > { %v297_v29 = vsub.f32 3.1415927, %v295_v28 }
 0x27f   : > { %v298_v30 = vsel %vm296_vm12, %v297_v29, %v295_v28 }
 0x280   : > { %v299_v31 = vmul.f32 %v298_v30, %v298_v30 }
 0x282   : > { %v300_v32 = vadd.f32 1e-06, %v299_v31 }
 0x284   : > { %536 = vrcp.f32 %v300_v32 }
 0x28a   : > { %v537_v35 = vpop.eup %536 }
 0x28b   : > { %v302_v37 = vsel %vm175_vm1, %v537_v35, 0.0 }
 0x28c   : > { %303 = vadd.xlane.f32.xlu1 %v302_v37 }
 0x28d   : > { %567 = shalt.err (!%p564_p3)
}
 0x28e   : > { %486 = dma.vmem_to_hbm [thread:$0]  (%p658_p5), %s381_s5, 128, %s383_s6, %s364_s7   ;;  %v324_v39 = vsub.f32 1.5, %v323_v38  ;;  %vm327_vm13 = vcmp.eq.f32.partialorder %v319_v25, inf  ;;  %v330_v43 = vand.u32 2147483648, %v319_v25  ;;  %vm329_vm14 = vcmp.eq.f32.partialorder %v319_v25, 0.0 }
 0x28f   : > { %vm316_vm15 = vcmp.gt.f32.partialorder %v697_v16, 0.5  ;;  %vm348_vm0 = vcmp.lt.f32.partialorder %v481_v13, 0.0  ;;  %s149_s26 = scalar_lea.vmem %s752_s2, %s474_s22 }
 0x290   : > { %v325_v40 = vmul.f32 %v535_v33, %v324_v39 }
 0x292   : > { %v326_v41 = vmul.f32 %v325_v40, %v319_v25 }
 0x294   : > { %v328_v42 = vsel %vm327_vm13, %v319_v25, %v326_v41 }
 0x295   : > { %v331_v44 = vsel %vm329_vm14, %v330_v43, %v328_v42 }
 0x296   : > { %v332_v45 = vsel %vm316_vm15, %v331_v44, %v697_v16 }
 0x297   : > { %v333_v46 = vmul.f32 %v332_v45, %v332_v45 }
 0x299   : > { %v334_v47 = vmul.f32 0.0421632, %v333_v46 }
 0x29b   : > { %v335_v48 = vadd.f32 0.024181312, %v334_v47 }
 0x29d   : > { %v336_v49 = vmul.f32 %v335_v48, %v333_v46 }
 0x29f   : > { %v337_v50 = vadd.f32 0.045470025, %v336_v49 }
 0x2a1   : > { %v338_v51 = vmul.f32 %v337_v50, %v333_v46 }
 0x2a3   : > { %v339_v52 = vadd.f32 0.074953005, %v338_v51 }
 0x2a5   : > { %v340_v53 = vmul.f32 %v339_v52, %v333_v46 }
 0x2a7   : > { %v341_v54 = vadd.f32 0.16666752, %v340_v53 }
 0x2a9   : > { %v342_v56 = vmul.f32 %v341_v54, %v333_v46 }
 0x2ab   : > { %v343_v57 = vmul.f32 %v342_v56, %v332_v45 }
 0x2ad   : > { %v344_v58 = vadd.f32 %v343_v57, %v332_v45 }
 0x2af   : > { %v345_v59 = vmul.f32 2.0, %v344_v58  ;;  %v346_v60 = vsub.f32 1.5707964, %v344_v58 }
 0x2b1   : > { %v347_v61 = vsel %vm316_vm15, %v345_v59, %v346_v60 }
 0x2b2   : > { %v349_v62 = vsub.f32 3.1415927, %v347_v61 }
 0x2b4   : > { %v350_v63 = vsel %vm348_vm0, %v349_v62, %v347_v61 }
 0x2b5   : > { %v351_v0 = vmul.f32 %v350_v63, %v350_v63 }
 0x2b7   : > { %v352_v1 = vadd.f32 1e-06, %v351_v0 }
 0x2b9   : > { %538 = vrcp.f32 %v352_v1 }
 0x2bf   : > { %v539_v2 = vpop.eup %538 }
 0x2c0   : > { %v354_v3 = vrot.slane %v539_v2, 4 }
 0x2c2   : > { %v355_v4 = vadd.f32 %v539_v2, %v354_v3 }
 0x2c4   : > { %v356_v5 = vrot.slane %v355_v4, 2 }
 0x2c6   : > { %v357_v8 = vadd.f32 %v356_v5, %v355_v4 }
 0x2c8   : > { %v358_v11 = vrot.slane %v357_v8, 1 }
 0x2ca   : > { %v359_v15 = vadd.f32 %v358_v11, %v357_v8 }
 0x2ff   : > { %v304_v6 = vpop.xlane.xlu1 %303 }
 0x300   : > { %v305_v7 = vrot.slane %v304_v6, 4 }
 0x302   : > { %v306_v9 = vadd.f32 %v305_v7, %v304_v6 }
 0x304   : > { %v307_v10 = vrot.slane %v306_v9, 2 }
 0x306   : > { %v308_v12 = vadd.f32 %v307_v10, %v306_v9 }
 0x308   : > { %v309_v14 = vrot.slane %v308_v12, 1 }
 0x30a   : > { %v310_v55 = vadd.f32 %v309_v14, %v308_v12 }
 0x30c   : > { %v360_v13 = vsub.f32 %v310_v55, %v359_v15 }
 0x30e   : > { %v361_v16 = vmul.f32 0.017857144, %v360_v13 }
 0x310   : > { %362 = vst [vmem:[%s149_s26] sm:$0xff] %v361_v16 }
 0x311 PF: > { %p492_p4 = scmp.ge.s32.totalorder %s602_s12, 2  ;;  %s397_s27 = sand.u32 1, %s590_s9  }
 0x312   : > { %s398_s28 = scalar_lea.sflag [#allocation3], %s397_s27 }
 0x313   : > { %p489_p5 = pnand %p492_p4, %p662_p6 }
 0x315   : > { %p490_p7 = pneg %p489_p5 }
 0x317   : > { %585 = dma.done.wait (%p490_p7), %s398_s28, 128  }
 0x318   : > { %587 = vsyncadd (%p490_p7), %s398_s28, 4294967168  ;;  %p13_p8 = scmp.ge.s32.totalorder %s645_s15, 4   ;;  %s755_s9 = smov %s594_s10 }
 0x319   : > { %s756_s10 = smov %s598_s11  ;;  %s757_s11 = smov %s656_s18 }
 0x31a   : > { %s758_s12 = smov %s645_s15  ;;  %15 = sbr.rel (!%p13_p8) target bundleno = 3 (0x3), region = 71 }
 0x31f   :  { %411 = vsyncpa [#allocation3], 1 }
 0x320   :  { %413 = vsyncpa [#allocation3 + $0x1], 1 }

</bundles_post_ra>
